<compile_context>
chip_gen: v7x
topology: tpu7x:2x2x1
jax: 0.10.0
libtpu: 0.0.40
codegen_flags: <defaults>
</compile_context>

<pallas_src>
import functools

import jax
import jax.numpy as jnp
from jax.experimental import pallas as pl
from jax.experimental.pallas import tpu as pltpu

_LANES = 128
_MAX_ROW_TILE = 4096   # (4096,128) f32 block = 2 MiB; 2 in x 2 buf + acc ~10.5 MiB
_NUM_SPLITS = 2        # leading "parallel" grid axis (both TCs on v7x)


def _count_loss_kernel(pred_ref, gt_ref, out_ref, acc_ref, *,
                       mse_weight, mae_weight, relative_weight,
                       row_tile, n_rows, tiles_per_split, needs_mask,
                       approx_reciprocal):
    i = pl.program_id(1)            # tile index within this split ("arbitrary")

    @pl.when(i == 0)
    def _():
        acc_ref[...] = jnp.zeros_like(acc_ref)

    pred = pred_ref[...].astype(jnp.float32)
    gt = gt_ref[...].astype(jnp.float32)

    diff = pred - gt
    abs_diff = jnp.abs(diff)
    # EUP reciprocal instead of a VALU divide.
    inv_gp1 = pl.reciprocal(gt + 1.0, approx=approx_reciprocal)

    # Fused per-element contribution of all three loss terms.
    fused = (diff * diff * mse_weight
             + abs_diff * (mae_weight + relative_weight * inv_gp1))

    if needs_mask:
        # Rows past the real array come from a partial (edge) block or a
        # clamped duplicate block whose VMEM contents are unspecified: select
        # them away (never multiply a mask into possible NaN/Inf).
        c = pl.program_id(0)
        t = c * tiles_per_split + i                       # unclamped linear tile id
        row_idx = t * row_tile + jax.lax.broadcasted_iota(jnp.int32, fused.shape, 0)
        fused = jnp.where(row_idx < n_rows, fused, 0.0)

    # Pure VALU elementwise accumulation into VMEM scratch (no per-step reduce).
    acc_ref[...] += fused

    @pl.when(i == tiles_per_split - 1)
    def _():
        # One sublane fold per split; cross-lane reduce + 1/N scaling happen in
        # the (trivial) wrapper epilogue.
        out_ref[...] = acc_ref[...].reshape(-1, 8, _LANES).sum(axis=0)


def improved_count_loss(pred_count, gt_count, *,
                        mse_weight=1.0, mae_weight=0.1, relative_weight=0.1,
                        label_smoothing=0.0,
                        row_tile=None,
                        approx_reciprocal=False,
                        xla_fallback_elems=1024):
    """Pallas implementation of ImprovedCountLoss.forward (eval / smoothing=0)."""
    # TODO(synk): LabelSmoothingLoss's training-time Gaussian target jitter
    # (label_smoothing > 0 while module.training) is intentionally not
    # reproduced; in eval mode it reduces to plain MSE, which this implements.
    assert pred_count.shape == gt_count.shape
    n_elems = pred_count.size
    assert n_elems > 0
    inv_n = 1.0 / float(n_elems)

    if n_elems < xla_fallback_elems:
        # Launch + padding + DMA setup dominate for tiny count vectors.
        p = pred_count.reshape(-1).astype(jnp.float32)
        g = gt_count.reshape(-1).astype(jnp.float32)
        d = p - g
        ad = jnp.abs(d)
        fused = d * d * mse_weight + ad * (mae_weight + relative_weight / (g + 1.0))
        return jnp.sum(fused) * inv_n

    pred_flat = pred_count.reshape(-1)
    gt_flat = gt_count.reshape(-1)

    # Lane-dense layout.  If n_elems % 128 == 0 the reshape is free (no HBM
    # copy); otherwise only the <=127-element lane tail is zero-padded (zero
    # padding is exact: d=0, |d|=0, 0/(0+1)=0).  Tiny inputs are bumped to at
    # least one full (8, 128) tile.
    n_rows = max(pl.cdiv(n_elems, _LANES), 8)
    padded_len = n_rows * _LANES
    if padded_len != n_elems:
        pred_flat = jnp.pad(pred_flat, (0, padded_len - n_elems))
        gt_flat = jnp.pad(gt_flat, (0, padded_len - n_elems))
    pred2d = pred_flat.reshape(n_rows, _LANES)
    gt2d = gt_flat.reshape(n_rows, _LANES)

    # Row tile: multiple of 8, never larger than the array (so blocks can only
    # overhang at the grid edge, which the in-kernel mask covers).
    max_fit = (n_rows // 8) * 8
    if row_tile is None:
        row_tile = min(_MAX_ROW_TILE, max_fit)
    row_tile = max(8, min((int(row_tile) // 8) * 8, max_fit))

    num_tiles = pl.cdiv(n_rows, row_tile)
    num_splits = min(_NUM_SPLITS, num_tiles)          # use both TCs only if >1 tile
    tiles_per_split = pl.cdiv(num_tiles, num_splits)
    needs_mask = (n_rows % row_tile != 0) or (num_splits * tiles_per_split != num_tiles)
    last_tile = num_tiles - 1

    def in_index_map(c, i):
        # Clamp so duplicate steps of an uneven split never index past the
        # array; their contribution is removed by the in-kernel row mask.
        return (jnp.minimum(c * tiles_per_split + i, last_tile), 0)

    kernel = functools.partial(
        _count_loss_kernel,
        mse_weight=float(mse_weight),
        mae_weight=float(mae_weight),
        relative_weight=float(relative_weight),
        row_tile=row_tile,
        n_rows=n_rows,
        tiles_per_split=tiles_per_split,
        needs_mask=needs_mask,
        approx_reciprocal=approx_reciprocal,
    )

    partials = pl.pallas_call(
        kernel,
        out_shape=jax.ShapeDtypeStruct((num_splits * 8, _LANES), jnp.float32),
        grid=(num_splits, tiles_per_split),
        in_specs=[
            pl.BlockSpec((row_tile, _LANES), in_index_map),
            pl.BlockSpec((row_tile, _LANES), in_index_map),
        ],
        out_specs=pl.BlockSpec((8, _LANES), lambda c, i: (c, 0)),
        scratch_shapes=[pltpu.VMEM((row_tile, _LANES), jnp.float32)],
        compiler_params=pltpu.CompilerParams(
            dimension_semantics=("parallel", "arbitrary")),
    )(pred2d, gt2d)

    return jnp.sum(partials) * inv_n


def _reference_loss(pred, gt, mse_w=1.0, mae_w=0.1, rel_w=0.1):
    pred = pred.astype(jnp.float32)
    gt = gt.astype(jnp.float32)
    diff = pred - gt
    mse = jnp.mean(diff * diff)
    mae = jnp.mean(jnp.abs(diff))
    rel = jnp.mean(jnp.abs(diff) / (gt + 1.0))
    return mse_w * mse + mae_w * mae + rel_w * rel


def _make_data(key, n):
    kp, kg = jax.random.split(key)
    gt = jax.random.uniform(kg, (n,), jnp.float32, minval=0.0, maxval=50.0)
    pred = gt + jax.random.normal(kp, (n,), jnp.float32) * 2.0
    return pred, gt


if __name__ == "__main__":
    root = jax.random.PRNGKey(0)
    k1, k2, k3, k4, k5 = jax.random.split(root, 5)

    # 1) Module-consistent small shape: per-image predicted counts, batch=64.
    #    Force the Pallas path (single (8,128) padded tile).
    pred, gt = _make_data(k1, 64)
    loss = jax.block_until_ready(improved_count_loss(pred, gt, xla_fallback_elems=0))
    ref = _reference_loss(pred, gt)
    assert jnp.allclose(loss, ref, rtol=1e-5, atol=1e-5), (loss, ref)

    # 2) Non-128-aligned size, forced tiny row tile -> multi-tile, 2-way split
    #    accumulation path (no mask needed).
    pred2, gt2 = _make_data(k2, 4000)
    loss2 = jax.block_until_ready(
        improved_count_loss(pred2, gt2, row_tile=8, xla_fallback_elems=0))
    ref2 = _reference_loss(pred2, gt2)
    assert jnp.allclose(loss2, ref2, rtol=1e-5, atol=1e-5), (loss2, ref2)

    # 3) Aligned size with an odd tile count -> exercises the clamped duplicate
    #    block + in-kernel row mask.
    pred3, gt3 = _make_data(k3, 3072)
    loss3 = jax.block_until_ready(
        improved_count_loss(pred3, gt3, row_tile=8, xla_fallback_elems=0))
    ref3 = _reference_loss(pred3, gt3)
    assert jnp.allclose(loss3, ref3, rtol=1e-5, atol=1e-5), (loss3, ref3)

    # 4) Aligned, single-tile default path (zero-copy reshape, no mask).
    pred4, gt4 = _make_data(k4, 65536)
    loss4 = jax.block_until_ready(improved_count_loss(pred4, gt4))
    ref4 = _reference_loss(pred4, gt4)
    assert jnp.allclose(loss4, ref4, rtol=1e-4, atol=1e-4), (loss4, ref4)

    # 5) Larger default path: big tiles, 2 splits, partial last block mask.
    pred5, gt5 = _make_data(k5, 1_000_000)
    loss5 = jax.block_until_ready(improved_count_loss(pred5, gt5))
    ref5 = _reference_loss(pred5, gt5)
    assert jnp.allclose(loss5, ref5, rtol=1e-4, atol=1e-4), (loss5, ref5)

    # 6) Tiny-input XLA fallback (default threshold).
    loss6 = jax.block_until_ready(improved_count_loss(pred[:10], gt[:10]))
    ref6 = _reference_loss(pred[:10], gt[:10])
    assert jnp.allclose(loss6, ref6, rtol=1e-5, atol=1e-5), (loss6, ref6)

    print("KERNEL_OK")
</pallas_src>

<mosaic_0001>
module attributes {stable_mosaic.version = 11 : i64} {
  func.func @_count_loss_kernel(%arg0: i32, %arg1: i32, %arg2: memref<8x128xf32, #tpu.memory_space<vmem>>, %arg3: memref<8x128xf32, #tpu.memory_space<vmem>>, %arg4: memref<8x128xf32, #tpu.memory_space<vmem>>, %arg5: memref<8x128xf32, #tpu.memory_space<vmem>>) attributes {dimension_semantics = [#tpu.dimension_semantics<parallel>, #tpu.dimension_semantics<arbitrary>], iteration_bounds = array<i64: 1, 1>, scalar_prefetch = 0 : i64, scratch_operands = 1 : i64, tpu.core_type = #tpu.core_type<tc>, window_params = [{transform_indices = @transform_0, window_bounds = array<i64: 8, 128>}, {transform_indices = @transform_1, window_bounds = array<i64: 8, 128>}, {transform_indices = @transform_2, window_bounds = array<i64: 8, 128>}]} {
    %c0_i32 = arith.constant 0 : i32
    %0 = arith.cmpi eq, %arg1, %c0_i32 : i32
    %1 = arith.extui %0 : i1 to i32
    %c0_i32_0 = arith.constant 0 : i32
    %2 = arith.cmpi ne, %1, %c0_i32_0 : i32
    scf.if %2 {
      %cst_13 = arith.constant 0.000000e+00 : f32
      %25 = vector.broadcast %cst_13 : f32 to vector<8x128xf32>
      %c0_14 = arith.constant 0 : index
      %c0_15 = arith.constant 0 : index
      %26 = vector.load %arg5[%c0_14, %c0_15] : memref<8x128xf32, #tpu.memory_space<vmem>>, vector<8x128xf32>
      tpu.vector_store %arg5[%c0_14, %c0_15], %25 {strides = array<i32>} : memref<8x128xf32, #tpu.memory_space<vmem>>, vector<8x128xf32>,
    } else {
    }
    %c0 = arith.constant 0 : index
    %c0_1 = arith.constant 0 : index
    %3 = vector.load %arg2[%c0, %c0_1] : memref<8x128xf32, #tpu.memory_space<vmem>>, vector<8x128xf32>
    %c0_2 = arith.constant 0 : index
    %c0_3 = arith.constant 0 : index
    %4 = vector.load %arg3[%c0_2, %c0_3] : memref<8x128xf32, #tpu.memory_space<vmem>>, vector<8x128xf32>
    %5 = arith.subf %3, %4 : vector<8x128xf32>
    %6 = math.absf %5 : vector<8x128xf32>
    %cst = arith.constant 1.000000e+00 : f32
    %7 = vector.broadcast %cst : f32 to vector<8x128xf32>
    %8 = arith.addf %4, %7 : vector<8x128xf32>
    %9 = tpu.reciprocal %8 : vector<8x128xf32> -> vector<8x128xf32>
    %10 = arith.mulf %5, %5 : vector<8x128xf32>
    %cst_4 = arith.constant 1.000000e+00 : f32
    %11 = vector.broadcast %cst_4 : f32 to vector<8x128xf32>
    %12 = arith.mulf %10, %11 : vector<8x128xf32>
    %cst_5 = arith.constant 1.000000e-01 : f32
    %13 = vector.broadcast %cst_5 : f32 to vector<8x128xf32>
    %14 = arith.mulf %13, %9 : vector<8x128xf32>
    %cst_6 = arith.constant 1.000000e-01 : f32
    %15 = vector.broadcast %cst_6 : f32 to vector<8x128xf32>
    %16 = arith.addf %15, %14 : vector<8x128xf32>
    %17 = arith.mulf %6, %16 : vector<8x128xf32>
    %18 = arith.addf %12, %17 : vector<8x128xf32>
    %c0_7 = arith.constant 0 : index
    %c0_8 = arith.constant 0 : index
    %19 = vector.load %arg5[%c0_7, %c0_8] : memref<8x128xf32, #tpu.memory_space<vmem>>, vector<8x128xf32>
    %20 = arith.addf %19, %18 : vector<8x128xf32>
    %c0_9 = arith.constant 0 : index
    %c0_10 = arith.constant 0 : index
    %21 = vector.load %arg5[%c0_9, %c0_10] : memref<8x128xf32, #tpu.memory_space<vmem>>, vector<8x128xf32>
    tpu.vector_store %arg5[%c0_9, %c0_10], %20 {strides = array<i32>} : memref<8x128xf32, #tpu.memory_space<vmem>>, vector<8x128xf32>,
    %c0_i32_11 = arith.constant 0 : i32
    %22 = arith.cmpi eq, %arg1, %c0_i32_11 : i32
    %23 = arith.extui %22 : i1 to i32
    %c0_i32_12 = arith.constant 0 : i32
    %24 = arith.cmpi ne, %23, %c0_i32_12 : i32
    scf.if %24 {
      %c0_13 = arith.constant 0 : index
      %c0_14 = arith.constant 0 : index
      %25 = vector.load %arg5[%c0_13, %c0_14] : memref<8x128xf32, #tpu.memory_space<vmem>>, vector<8x128xf32>
      %26 = vector.shape_cast %25 : vector<8x128xf32> to vector<1x8x128xf32>
      %cst_15 = arith.constant dense<0.000000e+00> : vector<8x128xf32>
      %27 = vector.multi_reduction <add>, %26, %cst_15 [0] : vector<1x8x128xf32> to vector<8x128xf32>
      %c0_16 = arith.constant 0 : index
      %c0_17 = arith.constant 0 : index
      %28 = vector.load %arg4[%c0_16, %c0_17] : memref<8x128xf32, #tpu.memory_space<vmem>>, vector<8x128xf32>
      tpu.vector_store %arg4[%c0_16, %c0_17], %27 {strides = array<i32>} : memref<8x128xf32, #tpu.memory_space<vmem>>, vector<8x128xf32>,
    } else {
    }
    return
  }
  func.func @transform_0(%arg0: i32, %arg1: i32) -> (i32, i32) {
    %c1_i32 = arith.constant 1 : i32
    %0 = arith.muli %arg0, %c1_i32 : i32
    %1 = arith.addi %0, %arg1 : i32
    %c0_i32 = arith.constant 0 : i32
    %2 = arith.minsi %1, %c0_i32 : i32
    %c0_i32_0 = arith.constant 0 : i32
    %c0_i32_1 = arith.constant 0 : i32
    return %2, %c0_i32_0 : i32, i32
  }
  func.func @transform_1(%arg0: i32, %arg1: i32) -> (i32, i32) {
    %c1_i32 = arith.constant 1 : i32
    %0 = arith.muli %arg0, %c1_i32 : i32
    %1 = arith.addi %0, %arg1 : i32
    %c0_i32 = arith.constant 0 : i32
    %2 = arith.minsi %1, %c0_i32 : i32
    %c0_i32_0 = arith.constant 0 : i32
    %c0_i32_1 = arith.constant 0 : i32
    return %2, %c0_i32_0 : i32, i32
  }
  func.func @transform_2(%arg0: i32, %arg1: i32) -> (i32, i32) {
    %c0_i32 = arith.constant 0 : i32
    %c0_i32_0 = arith.constant 0 : i32
    return %arg0, %c0_i32 : i32, i32
  }
}

</mosaic_0001>

<bundles_post_ra>
// kernel: tpu_custom_call.1
= control target key start
LH: loop header
LB: loop body
LE: loop exit
PB: predicated region body
PF: predicated region fallthrough
CT: control target
= control target key end

     0   :  { %7 = vsyncpa [#allocation4], 0  ;;  %s228_s0 = inlined_call_operand.hbm [shape: f32[8,128], index: 0, kind: input, shape index: {}]   ;;  %s229_s1 = inlined_call_operand.hbm [shape: f32[8,128], index: 1, kind: input, shape index: {}]   ;;  %s230_s2 = inlined_call_operand.hbm [shape: f32[8,128], index: 2, kind: output, shape index: {}]  }
   0x1   :  { %8 = vsyncpa [#allocation7], 0 }
   0x2   :  { %9 = vsyncpa [#allocation5], 0  ;;  %s174_s9 = smov [#allocation3]   ;;  %s175_s11 = smov [#allocation6]  }
   0x3   :  { %s21_s10 = sshll.u32 %s174_s9, 4  ;;  %s36_s12 = sshll.u32 %s175_s11, 4  ;;  %s22_s10 = int_to_ptr.vmem [resolvable:$true] %s21_s10  ;;  %s37_s12 = int_to_ptr.vmem [resolvable:$true] %s36_s12 }
   0x4   :  { %s102_s15 = scalar_lea.hbm %s228_s0, 128 }
   0x5   :  { %p103_p0 = scmp.ne.s32.totalorder %s228_s0, %s102_s15  ;;  %p106_p1 = scmp.lt.u32.totalorder %s102_s15, %s228_s0 }
   0x7   :  { %p108_p2 = pnand %p106_p1, %p103_p0 }
   0x9   :  { %111 = shalt.err (!%p108_p2)
}
   0xa   :  { %s112_s20 = scalar_lea.vmem %s22_s10, 128  ;;  %p117_p4 = scmp.lt.s32.totalorder %s22_s10, %s22_s10 }
   0xb   :  { %p113_p3 = scmp.ne.s32.totalorder %s22_s10, %s112_s20  ;;  %p118_p5 = scmp.lt.s32.totalorder %s112_s20, %s112_s20 }
   0xd   :  { %p119_p6 = por %p118_p5, %p117_p4 }
   0xf   :  { %p120_p7 = pnand %p119_p6, %p113_p3 }
  0x11   :  { %123 = shalt.err (!%p120_p7)
}
  0x12   :  { %24 = dma.hbm_to_vmem [thread:$0]  %s228_s0, 128, %s22_s10, [#allocation4]  }
  0x13   :  { %s124_s25 = scalar_lea.hbm %s229_s1, 128 }
  0x14   :  { %p125_p8 = scmp.ne.s32.totalorder %s229_s1, %s124_s25  ;;  %p128_p9 = scmp.lt.u32.totalorder %s124_s25, %s229_s1 }
  0x16   :  { %p130_p10 = pnand %p128_p9, %p125_p8 }
  0x18   :  { %133 = shalt.err (!%p130_p10)
}
  0x19   :  { %s134_s30 = scalar_lea.vmem %s37_s12, 128  ;;  %p139_p12 = scmp.lt.s32.totalorder %s37_s12, %s37_s12 }
  0x1a   :  { %p135_p11 = scmp.ne.s32.totalorder %s37_s12, %s134_s30  ;;  %p140_p13 = scmp.lt.s32.totalorder %s134_s30, %s134_s30 }
  0x1c   :  { %p141_p0 = por %p140_p13, %p139_p12 }
  0x1e   :  { %p142_p1 = pnand %p141_p0, %p135_p11 }
  0x20   :  { %145 = shalt.err (!%p142_p1)
}
  0x21   :  { %39 = dma.hbm_to_vmem [thread:$0]  %s229_s1, 128, %s37_s12, [#allocation7]  }
  0x22   :  { %168 = dma.done.wait [#allocation4], 128  }
  0x23   :  { %169 = vsyncadd [#allocation4], 4294967168 }
  0x24   :  { %170 = dma.done.wait [#allocation7], 128  }
  0x25   :  { %171 = vsyncadd [#allocation7], 4294967168  ;;  %v58_v0 = vld [vmem:[#allocation6] sm:$0xff]  ;;  %v57_v2 = vld [vmem:[#allocation3] sm:$0xff]  ;;  %s176_s4 = smov [#allocation8]  }
  0x26   :  { %v61_v1 = vadd.f32 1.0, %v58_v0  ;;  %v59_v3 = vsub.f32 %v57_v2, %v58_v0  ;;  %s83_s5 = sshll.u32 %s176_s4, 4  ;;  %s84_s5 = int_to_ptr.vmem [resolvable:$true] %s83_s5 }
  0x27   :  { %s146_s1 = scalar_lea.vmem %s84_s5, 128  ;;  %p151_p3 = scmp.lt.s32.totalorder %s84_s5, %s84_s5 }
  0x28   :  { %100 = vrcp.f32 %v61_v1  ;;  %v60_v5 = vand.u32 2147483647, %v59_v3  ;;  %v63_v7 = vmul.f32 %v59_v3, %v59_v3  ;;  %p147_p2 = scmp.ne.s32.totalorder %s84_s5, %s146_s1  ;;  %p152_p4 = scmp.lt.s32.totalorder %s146_s1, %s146_s1 }
  0x2a   :  { %p153_p5 = por %p152_p4, %p151_p3 }
  0x2c   :  { %p154_p6 = pnand %p153_p5, %p147_p2 }
  0x32   :  { %v101_v4 = vpop.eup %100 }
  0x33   :  { %v64_v6 = vmul.f32 0.1, %v101_v4 }
  0x35   :  { %v65_v8 = vadd.f32 0.1, %v64_v6 }
  0x37   :  { %v66_v9 = vmul.f32 %v65_v8, %v60_v5 }
  0x39   :  { %v67_v10 = vadd.f32 %v66_v9, %v63_v7 }
  0x3b   :  { %76 = vst [vmem:[#allocation8] sm:$0xff] %v67_v10 }
  0x3c   :  { %157 = shalt.err (!%p154_p6)
}
  0x3d   :  { %s158_s8 = scalar_lea.hbm %s230_s2, 128 }
  0x3e   :  { %p159_p7 = scmp.ne.s32.totalorder %s230_s2, %s158_s8  ;;  %p162_p8 = scmp.lt.u32.totalorder %s158_s8, %s230_s2 }
  0x40   :  { %p164_p9 = pnand %p162_p8, %p159_p7 }
  0x42   :  { %167 = shalt.err (!%p164_p9)
}
  0x43   :  { %86 = dma.vmem_to_hbm [thread:$0]  %s84_s5, 128, %s230_s2, [#allocation5]  }
  0x44   :  { %172 = dma.done.wait [#allocation5], 128  }
  0x45   :  { %173 = vsyncadd [#allocation5], 4294967168 }
  0x46   :  { %90 = vsyncpa [#allocation4], 1 }
  0x47   :  { %91 = vsyncpa [#allocation7], 1 }
  0x48   :  { %92 = vsyncpa [#allocation5], 1 }

</bundles_post_ra>
